<compile_context>
chip_gen: v6e
topology: v6e:2x2x1
jax: 0.10.0
libtpu: 0.0.40
codegen_flags: <defaults>
</compile_context>

<pallas_src>
import functools

import jax
import jax.numpy as jnp
from jax.experimental import pallas as pl
from jax.experimental.pallas import tpu as pltpu

LANE = 128            # lane width (last dim of a vreg)
MAX_ROW_TILE = 2048   # rows per grid step: (2048, 128) f32 = 1 MiB / input buffer


def _cdiv(a, b):
    return -(-a // b)


def _mse_partial_sum_kernel(x_ref, y_ref, o_ref, acc_ref, *,
                            rows, row_tile, inner, need_mask):
    i = pl.program_id(1)

    # Zero the vreg-shaped accumulator at the start of this shard's reduction.
    @pl.when(i == 0)
    def _():
        acc_ref[...] = jnp.zeros_like(acc_ref)

    d = x_ref[...].astype(jnp.float32) - y_ref[...].astype(jnp.float32)
    sq = d * d

    if need_mask:
        # Mask rows past the logical end of the array (ragged last tile and/or
        # the clamped duplicate tile on the second shard). Cheap VPU work,
        # hidden under the HBM-bound load stream.
        c = pl.program_id(0)
        row0 = (c * inner + i) * row_tile
        rid = jax.lax.broadcasted_iota(jnp.int32, (row_tile, 1), 0) + row0
        sq = jnp.where(rid < rows, sq, 0.0)

    # Fold (row_tile, 128) into the (8, 128) accumulator: straight VPU adds,
    # no cross-lane (XLU) reduction on the loop-carried path.
    acc_ref[...] += sq.reshape(row_tile // 8, 8, LANE).sum(axis=0)

    # Single cross-lane reduce per shard, only on the last step.
    @pl.when(i == pl.num_programs(1) - 1)
    def _():
        o_ref[...] = jnp.sum(acc_ref[...], keepdims=True)


def mse_loss(output_image, target_image):
    assert output_image.shape == target_image.shape
    n = output_image.size

    x = output_image.reshape(-1)
    y = target_image.reshape(-1)

    # Dtype-aware sublane granule: 8 rows for 4-byte, 16 for 2-byte, 32 for 1-byte.
    itemsize = jnp.dtype(output_image.dtype).itemsize
    sub = max(8, 32 // max(itemsize, 1))
    granule = sub * LANE

    main = (n // granule) * granule
    if main == 0:
        # Input smaller than one (sub, 128) tile: plain JAX (nothing to pipeline).
        d = x.astype(jnp.float32) - y.astype(jnp.float32)
        return jnp.sum(d * d) / n

    # No full-input pad: the multiple-of-granule prefix is a free reshape; the
    # (< granule elements) ragged tail is summed by a tiny jnp epilogue below.
    if main == n:
        xm = x.reshape(-1, LANE)
        ym = y.reshape(-1, LANE)
    else:
        xm = x[:main].reshape(-1, LANE)
        ym = y[:main].reshape(-1, LANE)

    rows = main // LANE                      # multiple of `sub` (>= 8)
    row_tile = min(MAX_ROW_TILE, rows)       # also a multiple of `sub`
    steps = _cdiv(rows, row_tile)            # number of row tiles
    shards = 2 if steps >= 2 else 1          # v7x: shard across both TensorCores
    inner = _cdiv(steps, shards)
    need_mask = (shards * inner * row_tile != rows)

    if shards * inner == steps:
        def in_map(c, i):
            return (c * inner + i, 0)
    else:
        # Clamp so no DMA is ever issued past the end of the array; the
        # duplicated tile is fully masked inside the kernel.
        def in_map(c, i):
            return (jnp.minimum(c * inner + i, steps - 1), 0)

    kernel = functools.partial(
        _mse_partial_sum_kernel,
        rows=rows, row_tile=row_tile, inner=inner, need_mask=need_mask)

    partial_sums = pl.pallas_call(
        kernel,
        out_shape=jax.ShapeDtypeStruct((shards, 1), jnp.float32),
        grid_spec=pltpu.PrefetchScalarGridSpec(
            num_scalar_prefetch=0,
            grid=(shards, inner),
            in_specs=[
                pl.BlockSpec((row_tile, LANE), in_map),
                pl.BlockSpec((row_tile, LANE), in_map),
            ],
            # One (1,1) partial per shard; resident across the inner (reduction) axis.
            out_specs=pl.BlockSpec((1, 1), lambda c, i: (c, 0)),
            scratch_shapes=[pltpu.VMEM((8, LANE), jnp.float32)],
        ),
        compiler_params=pltpu.CompilerParams(
            dimension_semantics=("parallel", "arbitrary"),
        ),
    )(xm, ym)

    total = jnp.sum(partial_sums)
    if main != n:
        dt = x[main:].astype(jnp.float32) - y[main:].astype(jnp.float32)
        total = total + jnp.sum(dt * dt)

    return total / n


if __name__ == "__main__":
    key = jax.random.PRNGKey(0)
    k1, k2 = jax.random.split(key)
    # NCHW like the PyTorch module: batch=2, channels=4, spatial=16x16.
    out_img = jax.random.normal(k1, (2, 4, 16, 16), dtype=jnp.float32)
    tgt_img = jax.random.normal(k2, (2, 4, 16, 16), dtype=jnp.float32)

    loss = jax.jit(mse_loss)(out_img, tgt_img)
    loss = jax.block_until_ready(loss)

    # Reference check against plain JAX (same as torch.nn.MSELoss default 'mean').
    ref = jnp.mean((out_img - tgt_img) ** 2)
    assert jnp.allclose(loss, ref, rtol=1e-5, atol=1e-6), (loss, ref)

    print("KERNEL_OK")
</pallas_src>

<mosaic_0001>
module attributes {stable_mosaic.version = 11 : i64} {
  func.func @_mse_partial_sum_kernel(%arg0: i32, %arg1: i32, %arg2: memref<16x128xf32, #tpu.memory_space<vmem>>, %arg3: memref<16x128xf32, #tpu.memory_space<vmem>>, %arg4: memref<1x1xf32, #tpu.memory_space<vmem>>, %arg5: memref<8x128xf32, #tpu.memory_space<vmem>>) attributes {dimension_semantics = [#tpu.dimension_semantics<parallel>, #tpu.dimension_semantics<arbitrary>], iteration_bounds = array<i64: 1, 1>, scalar_prefetch = 0 : i64, scratch_operands = 1 : i64, tpu.core_type = #tpu.core_type<tc>, window_params = [{transform_indices = @transform_0, window_bounds = array<i64: 16, 128>}, {transform_indices = @transform_1, window_bounds = array<i64: 16, 128>}, {transform_indices = @transform_2, window_bounds = array<i64: 1, 1>}]} {
    %c0_i32 = arith.constant 0 : i32
    %0 = arith.cmpi eq, %arg1, %c0_i32 : i32
    %1 = arith.extui %0 : i1 to i32
    %c0_i32_0 = arith.constant 0 : i32
    %2 = arith.cmpi ne, %1, %c0_i32_0 : i32
    scf.if %2 {
      %cst_10 = arith.constant 0.000000e+00 : f32
      %15 = vector.broadcast %cst_10 : f32 to vector<8x128xf32>
      %c0_11 = arith.constant 0 : index
      %c0_12 = arith.constant 0 : index
      %16 = vector.load %arg5[%c0_11, %c0_12] : memref<8x128xf32, #tpu.memory_space<vmem>>, vector<8x128xf32>
      tpu.vector_store %arg5[%c0_11, %c0_12], %15 {strides = array<i32>} : memref<8x128xf32, #tpu.memory_space<vmem>>, vector<8x128xf32>,
    } else {
    }
    %c0 = arith.constant 0 : index
    %c0_1 = arith.constant 0 : index
    %3 = vector.load %arg2[%c0, %c0_1] : memref<16x128xf32, #tpu.memory_space<vmem>>, vector<16x128xf32>
    %c0_2 = arith.constant 0 : index
    %c0_3 = arith.constant 0 : index
    %4 = vector.load %arg3[%c0_2, %c0_3] : memref<16x128xf32, #tpu.memory_space<vmem>>, vector<16x128xf32>
    %5 = arith.subf %3, %4 : vector<16x128xf32>
    %6 = arith.mulf %5, %5 : vector<16x128xf32>
    %c0_4 = arith.constant 0 : index
    %c0_5 = arith.constant 0 : index
    %7 = vector.load %arg5[%c0_4, %c0_5] : memref<8x128xf32, #tpu.memory_space<vmem>>, vector<8x128xf32>
    %8 = vector.shape_cast %6 : vector<16x128xf32> to vector<2x8x128xf32>
    %cst = arith.constant dense<0.000000e+00> : vector<8x128xf32>
    %9 = vector.multi_reduction <add>, %8, %cst [0] : vector<2x8x128xf32> to vector<8x128xf32>
    %10 = arith.addf %7, %9 : vector<8x128xf32>
    %c0_6 = arith.constant 0 : index
    %c0_7 = arith.constant 0 : index
    %11 = vector.load %arg5[%c0_6, %c0_7] : memref<8x128xf32, #tpu.memory_space<vmem>>, vector<8x128xf32>
    tpu.vector_store %arg5[%c0_6, %c0_7], %10 {strides = array<i32>} : memref<8x128xf32, #tpu.memory_space<vmem>>, vector<8x128xf32>,
    %c0_i32_8 = arith.constant 0 : i32
    %12 = arith.cmpi eq, %arg1, %c0_i32_8 : i32
    %13 = arith.extui %12 : i1 to i32
    %c0_i32_9 = arith.constant 0 : i32
    %14 = arith.cmpi ne, %13, %c0_i32_9 : i32
    scf.if %14 {
      %c0_10 = arith.constant 0 : index
      %c0_11 = arith.constant 0 : index
      %15 = vector.load %arg5[%c0_10, %c0_11] : memref<8x128xf32, #tpu.memory_space<vmem>>, vector<8x128xf32>
      %16 = vector.shape_cast %15 : vector<8x128xf32> to vector<1x8x128xf32>
      %cst_12 = arith.constant dense<0.000000e+00> : vector<1xf32>
      %17 = vector.multi_reduction <add>, %16, %cst_12 [1, 2] : vector<1x8x128xf32> to vector<1xf32>
      %18 = vector.shape_cast %17 : vector<1xf32> to vector<1x1x1xf32>
      %19 = vector.extract %18[0, 0, 0] : f32 from vector<1x1x1xf32>
      %20 = vector.broadcast %19 : f32 to vector<1x1xf32>
      %c0_13 = arith.constant 0 : index
      %c0_14 = arith.constant 0 : index
      %21 = vector.load %arg4[%c0_13, %c0_14] : memref<1x1xf32, #tpu.memory_space<vmem>>, vector<1x1xf32>
      tpu.vector_store %arg4[%c0_13, %c0_14], %20 {strides = array<i32>} : memref<1x1xf32, #tpu.memory_space<vmem>>, vector<1x1xf32>,
    } else {
    }
    return
  }
  func.func @transform_0(%arg0: i32, %arg1: i32) -> (i32, i32) {
    %c1_i32 = arith.constant 1 : i32
    %0 = arith.muli %arg0, %c1_i32 : i32
    %1 = arith.addi %0, %arg1 : i32
    %c0_i32 = arith.constant 0 : i32
    %c0_i32_0 = arith.constant 0 : i32
    return %1, %c0_i32 : i32, i32
  }
  func.func @transform_1(%arg0: i32, %arg1: i32) -> (i32, i32) {
    %c1_i32 = arith.constant 1 : i32
    %0 = arith.muli %arg0, %c1_i32 : i32
    %1 = arith.addi %0, %arg1 : i32
    %c0_i32 = arith.constant 0 : i32
    %c0_i32_0 = arith.constant 0 : i32
    return %1, %c0_i32 : i32, i32
  }
  func.func @transform_2(%arg0: i32, %arg1: i32) -> (i32, i32) {
    %c0_i32 = arith.constant 0 : i32
    %c0_i32_0 = arith.constant 0 : i32
    return %arg0, %c0_i32 : i32, i32
  }
}

</mosaic_0001>

<bundles_post_ra>
// kernel: mse_loss.1
= control target key start
LH: loop header
LB: loop body
LE: loop exit
PB: predicated region body
PF: predicated region fallthrough
CT: control target
= control target key end

     0   :  { %s171_s0 = inlined_call_operand.vmem [shape: f32[16,128], index: 0, kind: input, shape index: {}]   ;;  %s172_s1 = inlined_call_operand.vmem [shape: f32[16,128], index: 1, kind: input, shape index: {}]   ;;  %s173_s2 = inlined_call_operand.hbm [shape: f32[1,1], index: 2, kind: output, shape index: {}]  }
   0x1   :  { %v61_v0 = vld [vmem:[%s171_s0] sm:$0xff]  ;;  %v62_v1 = vld [vmem:[%s171_s0 + $0x8] sm:$0xff] }
   0x2   :  { %v63_v2 = vld [vmem:[%s172_s1] sm:$0xff]  ;;  %v64_v3 = vld [vmem:[%s172_s1 + $0x8] sm:$0xff] }
   0x3   :  { %v65_v4 = vsub.f32 %v61_v0, %v63_v2 }
   0x4   :  { %7 = vsyncpa [#allocation4], 0  ;;  %v66_v5 = vsub.f32 %v62_v1, %v64_v3  ;;  %s140_s0 = smov [#allocation3]   ;;  %vm87_vm0 = vcmask 0  }
   0x5   :  { %v67_v6 = vmul.f32 %v65_v4, %v65_v4  ;;  %s95_s17 = sshll.u32 %s140_s0, 4  ;;  %s96_s17 = int_to_ptr.vmem [resolvable:$true] %s95_s17 }
   0x6   :  { %v68_v7 = vmul.f32 %v66_v5, %v66_v5  ;;  %s118_s1 = scalar_lea.vmem %s96_s17, 16  ;;  %s122_s19 = scalar_lea.vmem %s96_s17, 32 }
   0x7   :  { %p119_p0 = scmp.ne.s32.totalorder %s96_s17, %s118_s1  ;;  %p123_p1 = scmp.lt.s32.totalorder %s96_s17, %s96_s17 }
   0x8   :  { %v70_v8 = vadd.f32 %v68_v7, %v67_v6  ;;  %p124_p2 = scmp.lt.s32.totalorder %s122_s19, %s118_s1 }
   0xa   :  { %77 = vadd.xlane.f32.xlu0 %v70_v8  ;;  %p125_p3 = por %p124_p2, %p123_p1 }
   0xc   :  { %p126_p4 = pnand %p125_p3, %p119_p0 }
  0x93   :  { %v78_v9 = vpop.xlane.xlu0 %77 }
  0x94   :  { %v79_v10 = vrot.slane %v78_v9, 4 }
  0x96   :  { %v80_v11 = vadd.f32 %v79_v10, %v78_v9 }
  0x98   :  { %v81_v12 = vrot.slane %v80_v11, 2 }
  0x9a   :  { %v82_v13 = vadd.f32 %v81_v12, %v80_v11 }
  0x9c   :  { %v83_v14 = vrot.slane %v82_v13, 1 }
  0x9e   :  { %v84_v15 = vadd.f32 %v83_v14, %v82_v13 }
  0xa0   :  { %115 = vpush %v84_v15 }
  0xd1   :  { %s116_s18 = spop %115 }
  0xd2   :  { %v86_v16 = vstv %s116_s18 }
  0xd3   :  { %88 = vst.msk [vmem:[#allocation3] sm:$0x1] %vm87_vm0, %v86_v16 }
  0xd4   :  { %129 = shalt.err (!%p126_p4)
}
  0xd5   :  { %98 = dma.vmem_to_hbm [thread:$0]  %s96_s17, 16, %s173_s2, [#allocation4]  }
  0xd6   :  { %138 = dma.done.wait [#allocation4], 16  }
  0xd7   :  { %139 = vsyncadd [#allocation4], 4294967280 }
  0xd8   :  { %102 = vsyncpa [#allocation4], 1 }

</bundles_post_ra>
